<compile_context>
chip_gen: v6e
topology: v6e:2x2x1
jax: 0.10.0
libtpu: 0.0.40
codegen_flags: <defaults>
</compile_context>

<pallas_src>
import numpy as np
import jax
import jax.numpy as jnp
from jax.experimental import pallas as pl
from jax.experimental.pallas import tpu as pltpu


def _compute_channels(orig_ch: int) -> int:
    channels = int(np.ceil(orig_ch / 6) * 2)
    if channels % 2:
        channels += 1
    return channels


def _build_tables(orig_ch, X, Y, Z):
    """Tiny separable sin/cos tables (NumPy; shapes are static)."""
    channels = _compute_channels(orig_ch)
    inv_freq = 1.0 / (
        10000.0 ** (np.arange(0, channels, 2, dtype=np.float32) / channels)
    )

    def axis_table(n):
        phase = np.arange(n, dtype=np.float32)[:, None] * inv_freq[None, :]
        return np.concatenate([np.sin(phase), np.cos(phase)], axis=-1)  # (n, channels)

    tx, ty, tz = axis_table(X), axis_table(Y), axis_table(Z)

    c = np.arange(orig_ch)
    group = c // channels          # 0 -> x, 1 -> y, 2 -> z
    lc = c % channels              # column into the per-axis (n, channels) table

    a_tab = np.where((group == 0)[:, None], tx.T[lc], 0.0).astype(np.float32)  # (C, X)
    b_tab = np.where((group == 1)[:, None], ty.T[lc], 0.0).astype(np.float32)  # (C, Y)
    z_tab = np.where((group == 2)[:, None], tz.T[lc], 0.0).astype(np.float32)  # (C, Z)

    bc_tab = (b_tab[:, :, None] + z_tab[:, None, :]).reshape(orig_ch, 1, Y * Z)
    a_tab = a_tab.reshape(orig_ch, X, 1)
    return a_tab, bc_tab


def _pos_enc_kernel(a_ref, bc_ref, o_ref):
    # a_ref: (C, X_blk, 1), bc_ref: (C, 1, YZ_blk), o_ref: (C, X_blk, YZ_blk)
    o_ref[...] = (a_ref[...] + bc_ref[...]).astype(o_ref.dtype)


def _pick_blocks(C, X, YZ, itemsize, budget_bytes=4 << 20):
    """Largest (X_blk, YZ_blk) output tile within the VMEM budget.

    Honors the BlockSpec rule: each of the last two block dims is either the
    full array extent or a multiple of (8, 128) respectively.
    """
    if C * X * YZ * itemsize <= budget_bytes:
        return X, YZ                                   # whole thing in one tile
    full_row = C * YZ * itemsize
    if full_row <= budget_bytes:                       # keep YZ lane-dense & full
        xb = (budget_bytes // full_row) // 8 * 8
        xb = max(8, min(xb, X))
        return xb, YZ
    # Very large Y*Z: split the lane axis too (multiple of 128).
    xb = X if X <= 8 else 8
    yzb = (budget_bytes // max(1, C * xb * itemsize)) // 128 * 128
    yzb = max(128, min(yzb, YZ))
    return xb, yzb


def sin_positional_encoding_3d(x):
    """x: (B, C, X, Y, Z) -> positional encoding (B, C, X, Y, Z)."""
    B, orig_ch, X, Y, Z = x.shape
    YZ = Y * Z

    a_np, bc_np = _build_tables(orig_ch, X, Y, Z)
    a_tab = jnp.asarray(a_np)     # (C, X, 1)   float32
    bc_tab = jnp.asarray(bc_np)   # (C, 1, Y*Z) float32

    itemsize = max(jnp.dtype(x.dtype).itemsize, 4)
    x_blk, yz_blk = _pick_blocks(orig_ch, X, YZ, itemsize)
    grid = (pl.cdiv(X, x_blk), pl.cdiv(YZ, yz_blk))

    emb = pl.pallas_call(
        _pos_enc_kernel,
        out_shape=jax.ShapeDtypeStruct((orig_ch, X, YZ), x.dtype),
        grid_spec=pltpu.PrefetchScalarGridSpec(
            num_scalar_prefetch=0,
            grid=grid,
            in_specs=[
                # A varies only with the X grid axis.
                pl.BlockSpec((orig_ch, x_blk, 1), lambda xi, yi: (0, xi, 0)),
                # BC varies only with the YZ grid axis (resident across X steps).
                pl.BlockSpec((orig_ch, 1, yz_blk), lambda xi, yi: (0, 0, yi)),
            ],
            out_specs=pl.BlockSpec((orig_ch, x_blk, yz_blk), lambda xi, yi: (0, xi, yi)),
        ),
        compiler_params=pltpu.CompilerParams(
            dimension_semantics=("parallel", "parallel"),
        ),
    )(a_tab, bc_tab)

    emb = emb.reshape(orig_ch, X, Y, Z)
    # PyTorch `.repeat(batch_size, 1, 1, 1, 1)` is pure replication -> broadcast.
    return jnp.broadcast_to(emb[None], (B, orig_ch, X, Y, Z))


def _reference(x_np):
    """NumPy port of the PyTorch forward for verification."""
    B, C, X, Y, Z = x_np.shape
    channels = _compute_channels(C)
    inv_freq = 1.0 / (
        10000.0 ** (np.arange(0, channels, 2, dtype=np.float32) / channels)
    )
    px = np.arange(X, dtype=np.float32)[:, None] * inv_freq[None, :]
    py = np.arange(Y, dtype=np.float32)[:, None] * inv_freq[None, :]
    pz = np.arange(Z, dtype=np.float32)[:, None] * inv_freq[None, :]
    emb_x = np.concatenate([np.sin(px), np.cos(px)], -1)
    emb_y = np.concatenate([np.sin(py), np.cos(py)], -1)
    emb_z = np.concatenate([np.sin(pz), np.cos(pz)], -1)
    emb = np.zeros((X, Y, Z, 3 * channels), dtype=np.float32)
    emb[..., :channels] = emb_x[:, None, None, :]
    emb[..., channels:2 * channels] = emb_y[None, :, None, :]
    emb[..., 2 * channels:] = emb_z[None, None, :, :]
    out = np.broadcast_to(emb[None, ..., :C], (B, X, Y, Z, C))
    return np.transpose(out, (0, 4, 1, 2, 3)).astype(x_np.dtype)


if __name__ == "__main__":
    key = jax.random.PRNGKey(0)
    # (batch=2, channels=4, x=8, y=8, z=8) -- matches the module's 5D NCDHW input.
    x = jax.random.normal(key, (2, 4, 8, 8, 8), dtype=jnp.float32)

    out = sin_positional_encoding_3d(x)
    out = jax.block_until_ready(out)

    ref = _reference(np.asarray(x))
    assert out.shape == (2, 4, 8, 8, 8)
    np.testing.assert_allclose(np.asarray(out), ref, atol=1e-5, rtol=1e-5)
    print("KERNEL_OK")
</pallas_src>

<mosaic_0001>
module attributes {stable_mosaic.version = 11 : i64} {
  func.func @_pos_enc_kernel(%arg0: i32, %arg1: i32, %arg2: memref<4x8x1xf32, #tpu.memory_space<vmem>>, %arg3: memref<4x1x64xf32, #tpu.memory_space<vmem>>, %arg4: memref<4x8x64xf32, #tpu.memory_space<vmem>>) attributes {dimension_semantics = [#tpu.dimension_semantics<parallel>, #tpu.dimension_semantics<parallel>], iteration_bounds = array<i64: 1, 1>, scalar_prefetch = 0 : i64, scratch_operands = 0 : i64, tpu.core_type = #tpu.core_type<tc>, window_params = [{transform_indices = @transform_0, window_bounds = array<i64: 4, 8, 1>}, {transform_indices = @transform_1, window_bounds = array<i64: 4, 1, 64>}, {transform_indices = @transform_2, window_bounds = array<i64: 4, 8, 64>}]} {
    %c0 = arith.constant 0 : index
    %c0_0 = arith.constant 0 : index
    %c0_1 = arith.constant 0 : index
    %0 = vector.load %arg2[%c0, %c0_0, %c0_1] : memref<4x8x1xf32, #tpu.memory_space<vmem>>, vector<4x8x1xf32>
    %c0_2 = arith.constant 0 : index
    %c0_3 = arith.constant 0 : index
    %c0_4 = arith.constant 0 : index
    %1 = vector.load %arg3[%c0_2, %c0_3, %c0_4] : memref<4x1x64xf32, #tpu.memory_space<vmem>>, vector<4x1x64xf32>
    %2 = vector.broadcast %0 : vector<4x8x1xf32> to vector<4x8x64xf32>
    %3 = vector.broadcast %1 : vector<4x1x64xf32> to vector<4x8x64xf32>
    %4 = arith.addf %2, %3 : vector<4x8x64xf32>
    %c0_5 = arith.constant 0 : index
    %c0_6 = arith.constant 0 : index
    %c0_7 = arith.constant 0 : index
    %5 = vector.load %arg4[%c0_5, %c0_6, %c0_7] : memref<4x8x64xf32, #tpu.memory_space<vmem>>, vector<4x8x64xf32>
    tpu.vector_store %arg4[%c0_5, %c0_6, %c0_7], %4 {strides = array<i32>} : memref<4x8x64xf32, #tpu.memory_space<vmem>>, vector<4x8x64xf32>,
    return
  }
  func.func @transform_0(%arg0: i32, %arg1: i32) -> (i32, i32, i32) {
    %c0_i32 = arith.constant 0 : i32
    %c0_i32_0 = arith.constant 0 : i32
    %c0_i32_1 = arith.constant 0 : i32
    return %c0_i32, %arg0, %c0_i32_0 : i32, i32, i32
  }
  func.func @transform_1(%arg0: i32, %arg1: i32) -> (i32, i32, i32) {
    %c0_i32 = arith.constant 0 : i32
    %c0_i32_0 = arith.constant 0 : i32
    %c0_i32_1 = arith.constant 0 : i32
    return %c0_i32, %c0_i32_0, %arg1 : i32, i32, i32
  }
  func.func @transform_2(%arg0: i32, %arg1: i32) -> (i32, i32, i32) {
    %c0_i32 = arith.constant 0 : i32
    %c0_i32_0 = arith.constant 0 : i32
    return %c0_i32, %arg0, %arg1 : i32, i32, i32
  }
}

</mosaic_0001>

<bundles_post_ra>
// kernel: tpu_custom_call.1
= control target key start
LH: loop header
LB: loop body
LE: loop exit
PB: predicated region body
PF: predicated region fallthrough
CT: control target
= control target key end

     0   :  { %v121_v2 = vmov 0   ;;  %s171_s0 = inlined_call_operand.vmem [shape: f32[4,8,1], index: 0, kind: input, shape index: {}]   ;;  %s172_s1 = inlined_call_operand.vmem [shape: f32[4,1,64], index: 1, kind: input, shape index: {}]   ;;  %s173_s2 = inlined_call_operand.hbm [shape: f32[4,8,64], index: 2, kind: output, shape index: {}]  }
   0x1   :  { %v14_v0 = vld [vmem:[%s171_s0 + $0x10] sm:$0xff]  ;;  %v12_v1 = vld [vmem:[%s171_s0] sm:$0xff]  ;;  %98 = vset.pattern.permute.xlu1 %v121_v2  ;;  %97 = vset.pattern.permute.xlu0 %v121_v2 }
   0x2   :  { %32 = vperm.xlu1 %98, %v14_v0   ;;  %22 = vperm.xlu0 %97, %v12_v1  }
   0x3   :  { %7 = vsyncpa [#allocation3], 0  ;;  %v15_v3 = vld [vmem:[%s171_s0 + $0x18] sm:$0xff]  ;;  %v13_v4 = vld [vmem:[%s171_s0 + $0x8] sm:$0xff]  ;;  %vm68_vm0 = vcmask 523264   ;;  %s122_s24 = smov [#allocation2]  }
   0x4   :  { %v91_v5 = vld [vmem:[%s172_s1 + $0x2] ss:$0 sm:$0xff]  ;;  %v89_v6 = vld [vmem:[%s172_s1] ss:$0 sm:$0xff]  ;;  %v92_v11 = vld [vmem:[%s172_s1 + $0x3] ss:$0 sm:$0xff] }
   0x5   :  { %v90_v12 = vld [vmem:[%s172_s1 + $0x1] ss:$0 sm:$0xff]  ;;  %s78_s25 = sshll.u32 %s122_s24, 4  ;;  %s79_s25 = int_to_ptr.vmem [resolvable:$true] %s78_s25 }
   0x6   :  { %37 = vperm.xlu1 %98, %v15_v3   ;;  %27 = vperm.xlu0 %97, %v13_v4   ;;  %s99_s26 = scalar_lea.vmem %s79_s25, 512  ;;  %p104_p1 = scmp.lt.s32.totalorder %s79_s25, %s79_s25 }
   0x7   :  { %p100_p0 = scmp.ne.s32.totalorder %s79_s25, %s99_s26  ;;  %p105_p2 = scmp.lt.s32.totalorder %s99_s26, %s99_s26 }
   0x9   :  { %p106_p3 = por %p105_p2, %p104_p1 }
   0xb   :  { %p107_p4 = pnand %p106_p3, %p100_p0 }
  0x7d   :  { %v33_v7 = vpop.permute.xlu1 %32  ;;  %v23_v8 = vpop.permute.xlu0 %22 }
  0x7e   :  { %v66_v9 = vadd.f32 %v91_v5, %v33_v7  ;;  %v64_v10 = vadd.f32 %v89_v6, %v23_v8 }
  0x80   :  { %71 = vst.msk [vmem:[#allocation2 + $0x10] sm:$0xff] %vm68_vm0, %v66_v9  ;;  %69 = vst.msk [vmem:[#allocation2] sm:$0xff] %vm68_vm0, %v64_v10 }
  0x81   :  { %v38_v13 = vpop.permute.xlu1 %37  ;;  %v28_v14 = vpop.permute.xlu0 %27 }
  0x82   :  { %v67_v15 = vadd.f32 %v92_v11, %v38_v13  ;;  %v65_v16 = vadd.f32 %v90_v12, %v28_v14 }
  0x84   :  { %72 = vst.msk [vmem:[#allocation2 + $0x18] sm:$0xff] %vm68_vm0, %v67_v15  ;;  %70 = vst.msk [vmem:[#allocation2 + $0x8] sm:$0xff] %vm68_vm0, %v65_v16 }
  0x85   :  { %110 = shalt.err (!%p107_p4)
}
  0x86   :  { %s123_s1 = smov 128   ;;  %s124_s27 = smov 8  }
  0x87   :  { %84 = dma.vmem_to_hbm [thread:$0]  %s79_s25, 512, %s173_s2, [#allocation3], %s123_s1, %s123_s1, %s124_s27  }
  0x88   :  { %119 = dma.done.wait [#allocation3], 512  }
  0x89   :  { %120 = vsyncadd [#allocation3], 4294966784 }
  0x8a   :  { %88 = vsyncpa [#allocation3], 1 }

</bundles_post_ra>
